<compile_context>
chip_gen: v7x
topology: tpu7x:2x2x1
jax: 0.10.0
libtpu: 0.0.40
codegen_flags: <defaults>
</compile_context>

<pallas_src>
import functools

import jax
import jax.numpy as jnp
from jax.experimental import pallas as pl
from jax.experimental.pallas import tpu as pltpu

LANES = 128
SUBLANES = 8
TILE_BYTES = 2 * 1024 * 1024      # per-input block budget (native streaming dtype)


def _num_tensorcores_per_device():
    """Best-effort TensorCores-per-device count (2 on v7x / megacore, else 1)."""
    try:
        kind = getattr(jax.devices()[0], "device_kind", "").lower()
    except Exception:
        return 1
    if "v7" in kind or "v4" in kind or "v5p" in kind:
        return 2
    return 1


def _depth_l2_kernel(pred_ref, gt_ref, out_ref, *, eps):
    # out_ref is a per-core (8,128) block resident across the inner (reduction)
    # axis -> it is the VMEM vector accumulator (full-vreg stores, no XLU).
    @pl.when(pl.program_id(1) == 0)
    def _():
        out_ref[...] = jnp.zeros_like(out_ref)

    # Inputs stream in their native dtype; upcast to f32 happens in-kernel only.
    pred = pred_ref[...].astype(jnp.float32)
    gt = gt_ref[...].astype(jnp.float32)

    diff = jnp.where(gt > eps, pred - gt, jnp.float32(0.0))
    sq = diff * diff

    # (row_tile,128) -> (row_tile//8, 8, 128) is layout-preserving; summing the
    # leading axis is pure VPU vreg adds (no cross-lane reduce, no iota/mask).
    rt = sq.shape[0]
    out_ref[...] += sq.reshape(rt // SUBLANES, SUBLANES, LANES).sum(axis=0)


def _masked_sq_sum(pred_flat, gt_flat, eps):
    p = pred_flat.astype(jnp.float32)
    g = gt_flat.astype(jnp.float32)
    d = jnp.where(g > eps, p - g, jnp.float32(0.0))
    return jnp.sum(d * d)


def depth_l2_loss(pred, gt, eps=1e-5, *, row_tile=None, ncore_split=None):
    """Pallas implementation of DepthL2Loss.forward. Returns (loss, numel)."""
    assert pred.shape == gt.shape
    numel = pred.size

    flat_pred = pred.reshape(-1)
    flat_gt = gt.reshape(-1)

    # 128-aligned prefix: can be viewed 2-D copy-free when numel % 128 == 0.
    aligned = (numel // LANES) * LANES
    rows = aligned // LANES

    itemsize = max(jnp.dtype(pred.dtype).itemsize, jnp.dtype(gt.dtype).itemsize)
    target_rows = max(SUBLANES, (TILE_BYTES // (LANES * itemsize)) // SUBLANES * SUBLANES)
    if row_tile is None:
        if rows >= SUBLANES:
            nblk = pl.cdiv(rows, target_rows)
            row_tile = min(target_rows,
                           max(SUBLANES, (rows // nblk) // SUBLANES * SUBLANES))
        else:
            row_tile = SUBLANES
    assert row_tile > 0 and row_tile % SUBLANES == 0

    row_blocks = rows // row_tile             # whole blocks fully inside the array
    kernel_elems = row_blocks * row_tile * LANES

    # Everything the kernel does not cover (< one block + sub-128 tail) is a
    # tiny plain-jnp reduction — no full-array pad / copy on ragged shapes.
    if kernel_elems < numel:
        tail_loss = _masked_sq_sum(flat_pred[kernel_elems:], flat_gt[kernel_elems:], eps)
    else:
        tail_loss = jnp.float32(0.0)

    if row_blocks == 0:
        return tail_loss, numel

    if ncore_split is None:
        ncore_split = _num_tensorcores_per_device()
    if ncore_split < 1 or row_blocks % ncore_split != 0:
        ncore_split = 1               # exact grid: no clamped duplicate blocks
    n_inner = row_blocks // ncore_split

    # 2-D views of the 128-aligned prefix.  A copy-producing slice only happens
    # when numel is not a multiple of 128, and then only of the aligned prefix
    # (no pad-value fill, no over-allocation).
    if aligned != numel:
        flat_pred = flat_pred[:aligned]
        flat_gt = flat_gt[:aligned]
    pred2d = flat_pred.reshape(rows, LANES)
    gt2d = flat_gt.reshape(rows, LANES)

    def in_map(c, i):
        return (c * n_inner + i, 0)   # exact: block ids cover [0, row_blocks)

    kernel = functools.partial(_depth_l2_kernel, eps=eps)

    bytes_in = kernel_elems * (jnp.dtype(pred.dtype).itemsize
                               + jnp.dtype(gt.dtype).itemsize)
    cost = pl.CostEstimate(
        flops=5 * kernel_elems,
        transcendentals=0,
        bytes_accessed=bytes_in + ncore_split * SUBLANES * LANES * 4,
    )

    partials = pl.pallas_call(
        kernel,
        out_shape=jax.ShapeDtypeStruct((ncore_split * SUBLANES, LANES), jnp.float32),
        grid_spec=pltpu.PrefetchScalarGridSpec(
            num_scalar_prefetch=0,
            grid=(ncore_split, n_inner),
            in_specs=[
                pl.BlockSpec((row_tile, LANES), in_map),
                pl.BlockSpec((row_tile, LANES), in_map),
            ],
            out_specs=pl.BlockSpec((SUBLANES, LANES), lambda c, i: (c, 0)),
        ),
        compiler_params=pltpu.CompilerParams(
            # If xprof shows only one TC engaged on v7x, switch the leading
            # axis to pltpu.CORE_PARALLEL.
            dimension_semantics=("parallel", "arbitrary"),
            vmem_limit_bytes=32 * 1024 * 1024,
        ),
        cost_estimate=cost,
    )(pred2d, gt2d)

    # Tiny (ncore_split*8, 128) partial slab -> scalar in the wrapper.
    return jnp.sum(partials) + tail_loss, numel


def depth_l2_loss_ref(pred, gt, eps=1e-5):
    p = pred.astype(jnp.float32)
    g = gt.astype(jnp.float32)
    mask = g > eps
    img1 = jnp.where(mask, p, 0.0)
    img2 = jnp.where(mask, g, 0.0)
    return jnp.sum((img1 - img2) ** 2), pred.size


if __name__ == "__main__":
    key = jax.random.PRNGKey(0)
    k1, k2, k3, k4, k5, k6 = jax.random.split(key, 6)
    eps = 1e-5

    def make(kp, kg, shape, dtype=jnp.float32):
        pred = jax.random.uniform(kp, shape, dtype=jnp.float32, minval=0.0, maxval=2.0)
        gt_raw = jax.random.uniform(kg, shape, dtype=jnp.float32, minval=-0.5, maxval=2.0)
        gt = jnp.where(gt_raw > 0.5, gt_raw, 0.0)   # some invalid (<= eps) depths
        return pred.astype(dtype), gt.astype(dtype)

    def check(loss, numel, pred, gt, atol=1e-3):
        ref_loss, ref_numel = depth_l2_loss_ref(pred, gt, eps)
        assert numel == ref_numel
        assert jnp.allclose(loss, ref_loss, rtol=1e-5, atol=atol), (loss, ref_loss)

    # 1) Aligned NCHW depth maps — single kernel block, no wrapper tail.
    pred, gt = make(k1, k2, (2, 4, 32, 32))
    loss, numel = depth_l2_loss(pred, gt, eps)
    jax.block_until_ready(loss)
    check(loss, numel, pred, gt)

    # 2) Ragged shape (numel % 128 != 0): kernel on the block-aligned prefix,
    #    < one block of tail handled in the wrapper (no jnp.pad copy).
    pred2, gt2 = make(k3, k4, (2, 3, 37, 41))
    loss2, numel2 = depth_l2_loss(pred2, gt2, eps)
    jax.block_until_ready(loss2)
    check(loss2, numel2, pred2, gt2)

    # 3) Multi-block accumulation + 2-way core split (serial loop on 1-TC chips).
    pred3, gt3 = make(k5, k6, (2, 4, 32, 32))
    loss3, numel3 = depth_l2_loss(pred3, gt3, eps, row_tile=16, ncore_split=2)
    jax.block_until_ready(loss3)
    check(loss3, numel3, pred3, gt3)

    # 4) bf16 inputs streamed natively (f32 math in-kernel).
    pred4, gt4 = make(k1, k4, (2, 4, 32, 32), dtype=jnp.bfloat16)
    loss4, numel4 = depth_l2_loss(pred4, gt4, eps)
    jax.block_until_ready(loss4)
    check(loss4, numel4, pred4, gt4, atol=5e-2)

    print("KERNEL_OK")
</pallas_src>

<mosaic_0001>
module attributes {stable_mosaic.version = 11 : i64} {
  func.func @_depth_l2_kernel(%arg0: i32, %arg1: i32, %arg2: memref<64x128xf32, #tpu.memory_space<vmem>>, %arg3: memref<64x128xf32, #tpu.memory_space<vmem>>, %arg4: memref<8x128xf32, #tpu.memory_space<vmem>>) attributes {dimension_semantics = [#tpu.dimension_semantics<parallel>, #tpu.dimension_semantics<arbitrary>], iteration_bounds = array<i64: 1, 1>, scalar_prefetch = 0 : i64, scratch_operands = 0 : i64, tpu.core_type = #tpu.core_type<tc>, window_params = [{transform_indices = @transform_0, window_bounds = array<i64: 64, 128>}, {transform_indices = @transform_1, window_bounds = array<i64: 64, 128>}, {transform_indices = @transform_2, window_bounds = array<i64: 8, 128>}]} {
    %c0_i32 = arith.constant 0 : i32
    %0 = arith.cmpi eq, %arg1, %c0_i32 : i32
    %1 = arith.extui %0 : i1 to i32
    %c0_i32_0 = arith.constant 0 : i32
    %2 = arith.cmpi ne, %1, %c0_i32_0 : i32
    scf.if %2 {
      %cst_10 = arith.constant 0.000000e+00 : f32
      %16 = vector.broadcast %cst_10 : f32 to vector<8x128xf32>
      %c0_11 = arith.constant 0 : index
      %c0_12 = arith.constant 0 : index
      %17 = vector.load %arg4[%c0_11, %c0_12] : memref<8x128xf32, #tpu.memory_space<vmem>>, vector<8x128xf32>
      tpu.vector_store %arg4[%c0_11, %c0_12], %16 {strides = array<i32>} : memref<8x128xf32, #tpu.memory_space<vmem>>, vector<8x128xf32>,
    } else {
    }
    %c0 = arith.constant 0 : index
    %c0_1 = arith.constant 0 : index
    %3 = vector.load %arg2[%c0, %c0_1] : memref<64x128xf32, #tpu.memory_space<vmem>>, vector<64x128xf32>
    %c0_2 = arith.constant 0 : index
    %c0_3 = arith.constant 0 : index
    %4 = vector.load %arg3[%c0_2, %c0_3] : memref<64x128xf32, #tpu.memory_space<vmem>>, vector<64x128xf32>
    %cst = arith.constant 9.99999974E-6 : f32
    %5 = vector.broadcast %cst : f32 to vector<64x128xf32>
    %6 = arith.cmpf ogt, %4, %5 : vector<64x128xf32>
    %7 = arith.subf %3, %4 : vector<64x128xf32>
    %cst_4 = arith.constant 0.000000e+00 : f32
    %8 = vector.broadcast %cst_4 : f32 to vector<64x128xf32>
    %9 = arith.select %6, %7, %8 : vector<64x128xi1>, vector<64x128xf32>
    %10 = arith.mulf %9, %9 : vector<64x128xf32>
    %c0_5 = arith.constant 0 : index
    %c0_6 = arith.constant 0 : index
    %11 = vector.load %arg4[%c0_5, %c0_6] : memref<8x128xf32, #tpu.memory_space<vmem>>, vector<8x128xf32>
    %12 = vector.shape_cast %10 : vector<64x128xf32> to vector<8x8x128xf32>
    %cst_7 = arith.constant dense<0.000000e+00> : vector<8x128xf32>
    %13 = vector.multi_reduction <add>, %12, %cst_7 [0] : vector<8x8x128xf32> to vector<8x128xf32>
    %14 = arith.addf %11, %13 : vector<8x128xf32>
    %c0_8 = arith.constant 0 : index
    %c0_9 = arith.constant 0 : index
    %15 = vector.load %arg4[%c0_8, %c0_9] : memref<8x128xf32, #tpu.memory_space<vmem>>, vector<8x128xf32>
    tpu.vector_store %arg4[%c0_8, %c0_9], %14 {strides = array<i32>} : memref<8x128xf32, #tpu.memory_space<vmem>>, vector<8x128xf32>,
    return
  }
  func.func @transform_0(%arg0: i32, %arg1: i32) -> (i32, i32) {
    %c1_i32 = arith.constant 1 : i32
    %0 = arith.muli %arg0, %c1_i32 : i32
    %1 = arith.addi %0, %arg1 : i32
    %c0_i32 = arith.constant 0 : i32
    %c0_i32_0 = arith.constant 0 : i32
    return %1, %c0_i32 : i32, i32
  }
  func.func @transform_1(%arg0: i32, %arg1: i32) -> (i32, i32) {
    %c1_i32 = arith.constant 1 : i32
    %0 = arith.muli %arg0, %c1_i32 : i32
    %1 = arith.addi %0, %arg1 : i32
    %c0_i32 = arith.constant 0 : i32
    %c0_i32_0 = arith.constant 0 : i32
    return %1, %c0_i32 : i32, i32
  }
  func.func @transform_2(%arg0: i32, %arg1: i32) -> (i32, i32) {
    %c0_i32 = arith.constant 0 : i32
    %c0_i32_0 = arith.constant 0 : i32
    return %arg0, %c0_i32 : i32, i32
  }
}

</mosaic_0001>

<bundles_post_ra>
// kernel: tpu_custom_call.1
= control target key start
LH: loop header
LB: loop body
LE: loop exit
PB: predicated region body
PF: predicated region fallthrough
CT: control target
= control target key end

     0   :  { %7 = vsyncpa [#allocation3], 0  ;;  %s265_s0 = inlined_call_operand.hbm [shape: f32[64,128], index: 0, kind: input, shape index: {}]   ;;  %s266_s1 = inlined_call_operand.hbm [shape: f32[64,128], index: 1, kind: input, shape index: {}]   ;;  %s267_s2 = inlined_call_operand.hbm [shape: f32[8,128], index: 2, kind: output, shape index: {}]  }
   0x1   :  { %8 = vsyncpa [#allocation6], 0 }
   0x2   :  { %9 = vsyncpa [#allocation4], 0  ;;  %s209_s9 = smov [#allocation2]   ;;  %s137_s13 = scalar_lea.hbm %s265_s0, 1024 }
   0x3   :  { %s19_s10 = sshll.u32 %s209_s9, 4  ;;  %p138_p0 = scmp.ne.s32.totalorder %s265_s0, %s137_s13  ;;  %s20_s10 = int_to_ptr.vmem [resolvable:$true] %s19_s10 }
   0x4   :  { %p141_p1 = scmp.lt.u32.totalorder %s137_s13, %s265_s0 }
   0x6   :  { %p143_p2 = pnand %p141_p1, %p138_p0 }
   0x8   :  { %146 = shalt.err (!%p143_p2)
}
   0x9   :  { %s147_s18 = scalar_lea.vmem %s20_s10, 1024  ;;  %p152_p4 = scmp.lt.s32.totalorder %s20_s10, %s20_s10 }
   0xa   :  { %p148_p3 = scmp.ne.s32.totalorder %s20_s10, %s147_s18  ;;  %p153_p5 = scmp.lt.s32.totalorder %s147_s18, %s147_s18 }
   0xc   :  { %p154_p6 = por %p153_p5, %p152_p4 }
   0xe   :  { %p155_p7 = pnand %p154_p6, %p148_p3 }
  0x10   :  { %158 = shalt.err (!%p155_p7)
}
  0x11   :  { %s210_s19 = smov 128   ;;  %s211_s20 = smov 8  }
  0x12   :  { %25 = dma.hbm_to_vmem [thread:$0]  %s265_s0, 1024, %s20_s10, [#allocation3], %s210_s19, %s210_s19, %s211_s20  }
  0x13   :  { %s212_s23 = smov [#allocation5]   ;;  %s159_s27 = scalar_lea.hbm %s266_s1, 1024 }
  0x14   :  { %s35_s24 = sshll.u32 %s212_s23, 4  ;;  %p160_p8 = scmp.ne.s32.totalorder %s266_s1, %s159_s27  ;;  %s36_s24 = int_to_ptr.vmem [resolvable:$true] %s35_s24 }
  0x15   :  { %p163_p9 = scmp.lt.u32.totalorder %s159_s27, %s266_s1 }
  0x17   :  { %p165_p10 = pnand %p163_p9, %p160_p8 }
  0x19   :  { %168 = shalt.err (!%p165_p10)
}
  0x1a   :  { %s169_s4 = scalar_lea.vmem %s36_s24, 1024  ;;  %p174_p12 = scmp.lt.s32.totalorder %s36_s24, %s36_s24 }
  0x1b   :  { %p170_p11 = scmp.ne.s32.totalorder %s36_s24, %s169_s4  ;;  %p175_p13 = scmp.lt.s32.totalorder %s169_s4, %s169_s4 }
  0x1d   :  { %p176_p0 = por %p175_p13, %p174_p12 }
  0x1f   :  { %p177_p1 = pnand %p176_p0, %p170_p11 }
  0x21   :  { %180 = shalt.err (!%p177_p1)
}
  0x22   :  { %41 = dma.hbm_to_vmem [thread:$0]  %s266_s1, 1024, %s36_s24, [#allocation6], %s210_s19, %s210_s19, %s211_s20  }
  0x23   :  { %203 = dma.done.wait [#allocation3], 1024  }
  0x24   :  { %204 = vsyncadd [#allocation3], 4294966272 }
  0x25   :  { %205 = dma.done.wait [#allocation6], 1024  }
  0x26   :  { %206 = vsyncadd [#allocation6], 4294966272  ;;  %v57_v0 = vld [vmem:[#allocation2] sm:$0xff]  ;;  %v58_v1 = vld [vmem:[#allocation2 + $0x8] sm:$0xff]  ;;  %s213_s1 = smov [#allocation7]  }
  0x27   :  { %v59_v2 = vld [vmem:[#allocation2 + $0x10] sm:$0xff]  ;;  %v60_v3 = vld [vmem:[#allocation2 + $0x18] sm:$0xff]  ;;  %v61_v4 = vld [vmem:[#allocation2 + $0x20] sm:$0xff]  ;;  %s121_s6 = sshll.u32 %s213_s1, 4  ;;  %s122_s6 = int_to_ptr.vmem [resolvable:$true] %s121_s6 }
  0x28   :  { %v65_v5 = vld [vmem:[#allocation5] sm:$0xff]  ;;  %v66_v6 = vld [vmem:[#allocation5 + $0x8] sm:$0xff]  ;;  %v67_v7 = vld [vmem:[#allocation5 + $0x10] sm:$0xff]  ;;  %s181_s7 = scalar_lea.vmem %s122_s6, 128  ;;  %p186_p3 = scmp.lt.s32.totalorder %s122_s6, %s122_s6 }
  0x29   :  { %v68_v8 = vld [vmem:[#allocation5 + $0x18] sm:$0xff]  ;;  %vm73_vm0 = vcmp.gt.f32.partialorder %v65_v5, 1e-05  ;;  %v81_v9 = vsub.f32 %v57_v0, %v65_v5  ;;  %v69_v10 = vld [vmem:[#allocation5 + $0x20] sm:$0xff]  ;;  %vm74_vm1 = vcmp.gt.f32.partialorder %v66_v6, 1e-05  ;;  %v82_v11 = vsub.f32 %v58_v1, %v66_v6  ;;  %p182_p2 = scmp.ne.s32.totalorder %s122_s6, %s181_s7  ;;  %p187_p4 = scmp.lt.s32.totalorder %s181_s7, %s181_s7 }
  0x2a   :  { %v83_v12 = vsub.f32 %v59_v2, %v67_v7  ;;  %v84_v13 = vsub.f32 %v60_v3, %v68_v8  ;;  %v62_v14 = vld [vmem:[#allocation2 + $0x28] sm:$0xff]  ;;  %vm75_vm2 = vcmp.gt.f32.partialorder %v67_v7, 1e-05  ;;  %vm76_vm3 = vcmp.gt.f32.partialorder %v68_v8, 1e-05  ;;  %v63_v17 = vld [vmem:[#allocation2 + $0x30] sm:$0xff] }
  0x2b   :  { %v70_v15 = vld [vmem:[#allocation5 + $0x28] sm:$0xff]  ;;  %v85_v16 = vsub.f32 %v61_v4, %v69_v10  ;;  %v71_v18 = vld [vmem:[#allocation5 + $0x30] sm:$0xff]  ;;  %vm77_vm4 = vcmp.gt.f32.partialorder %v69_v10, 1e-05  ;;  %v89_v19 = vsel %vm73_vm0, %v81_v9, 0.0  ;;  %v90_v20 = vsel %vm74_vm1, %v82_v11, 0.0  ;;  %p188_p5 = por %p187_p4, %p186_p3 }
  0x2c   :  { %v86_v21 = vsub.f32 %v62_v14, %v70_v15  ;;  %v91_v22 = vsel %vm75_vm2, %v83_v12, 0.0  ;;  %v92_v23 = vsel %vm76_vm3, %v84_v13, 0.0  ;;  %v64_v24 = vld [vmem:[#allocation2 + $0x38] sm:$0xff]  ;;  %vm78_vm5 = vcmp.gt.f32.partialorder %v70_v15, 1e-05 }
  0x2d   :  { %v72_v25 = vld [vmem:[#allocation5 + $0x38] sm:$0xff]  ;;  %v97_v26 = vmul.f32 %v89_v19, %v89_v19  ;;  %v98_v27 = vmul.f32 %v90_v20, %v90_v20  ;;  %v87_v28 = vsub.f32 %v63_v17, %v71_v18  ;;  %v93_v29 = vsel %vm77_vm4, %v85_v16, 0.0  ;;  %p189_p6 = pnand %p188_p5, %p182_p2 }
  0x2e   :  { %v99_v30 = vmul.f32 %v91_v22, %v91_v22  ;;  %vm79_vm6 = vcmp.gt.f32.partialorder %v71_v18, 1e-05  ;;  %v100_v31 = vmul.f32 %v92_v23, %v92_v23  ;;  %v88_v33 = vsub.f32 %v64_v24, %v72_v25 }
  0x2f   :  { %v106_v32 = vadd.f32 %v98_v27, %v97_v26  ;;  %v94_v34 = vsel %vm78_vm5, %v86_v21, 0.0  ;;  %vm80_vm7 = vcmp.gt.f32.partialorder %v72_v25, 1e-05  ;;  %v101_v35 = vmul.f32 %v93_v29, %v93_v29 }
  0x30   :  { %v95_v37 = vsel %vm79_vm6, %v87_v28, 0.0  ;;  %v102_v38 = vmul.f32 %v94_v34, %v94_v34  ;;  %v96_v40 = vsel %vm80_vm7, %v88_v33, 0.0 }
  0x31   :  { %v107_v36 = vadd.f32 %v106_v32, %v99_v30  ;;  %v103_v41 = vmul.f32 %v95_v37, %v95_v37  ;;  %v104_v43 = vmul.f32 %v96_v40, %v96_v40 }
  0x33   :  { %v108_v39 = vadd.f32 %v107_v36, %v100_v31 }
  0x35   :  { %v109_v42 = vadd.f32 %v108_v39, %v101_v35 }
  0x37   :  { %v110_v44 = vadd.f32 %v109_v42, %v102_v38 }
  0x39   :  { %v111_v45 = vadd.f32 %v110_v44, %v103_v41 }
  0x3b   :  { %v112_v46 = vadd.f32 %v111_v45, %v104_v43 }
  0x3d   :  { %114 = vst [vmem:[#allocation7] sm:$0xff] %v112_v46 }
  0x3e   :  { %192 = shalt.err (!%p189_p6)
}
  0x3f   :  { %s193_s10 = scalar_lea.hbm %s267_s2, 128 }
  0x40   :  { %p194_p7 = scmp.ne.s32.totalorder %s267_s2, %s193_s10  ;;  %p197_p8 = scmp.lt.u32.totalorder %s193_s10, %s267_s2 }
  0x42   :  { %p199_p9 = pnand %p197_p8, %p194_p7 }
  0x44   :  { %202 = shalt.err (!%p199_p9)
}
  0x45   :  { %124 = dma.vmem_to_hbm [thread:$0]  %s122_s6, 128, %s267_s2, [#allocation4]  }
  0x46   :  { %207 = dma.done.wait [#allocation4], 128  }
  0x47   :  { %208 = vsyncadd [#allocation4], 4294967168 }
  0x48   :  { %128 = vsyncpa [#allocation3], 1 }
  0x49   :  { %129 = vsyncpa [#allocation6], 1 }
  0x4a   :  { %130 = vsyncpa [#allocation4], 1 }

</bundles_post_ra>
